<compile_context>
chip_gen: v7x
topology: tpu7x:2x2x1
jax: 0.10.0
libtpu: 0.0.40
codegen_flags: <defaults>
</compile_context>

<pallas_src>
import jax
import jax.numpy as jnp
from jax.experimental import pallas as pl
from jax.experimental.pallas import tpu as pltpu

LANE = 128            # TPU lane width: 128 batch elements per row.
MAX_ROW_TILE = 4096   # rows / grid step: ~6 MiB of HBM traffic per step,
                      # ~12.3 MiB double-buffered VMEM (fits v5e's 16 MiB default).


def _linear_kernel(b_ref, x_ref, wexp_ref, o_ref):
    """One (TBR, 256) interleaved input block -> (TBR, 128) dense output block.

    b_ref    : (1, 1) f32 in SMEM                    bias
    x_ref    : (TBR, 2*LANE) in VMEM     row r, lane 2j / 2j+1 = x0 / x1 of batch r*128+j
    wexp_ref : (2*LANE, LANE) f32 in VMEM            E[2j, j] = w0, E[2j+1, j] = w1
    o_ref    : (TBR, LANE) in VMEM                   lane j of row r = y[r*128 + j]
    """
    x = x_ref[...].astype(jnp.float32)
    # De-interleave + 2-term contraction in a single MXU pass (hidden under DMA).
    y = jnp.dot(
        x,
        wexp_ref[...],
        preferred_element_type=jnp.float32,
        precision=jax.lax.Precision.HIGHEST,
    )
    o_ref[...] = (y + b_ref[0, 0]).astype(o_ref.dtype)


def _choose_row_tiling(num_rows):
    """Pick (row_tile, grid_steps) for a (num_rows, 256) f32 input.

    num_rows is already a multiple of 8 when <= 16 (wrapper guarantees this).
    """
    if num_rows <= 16:
        return num_rows, 1  # single full-array block (tiny problem)
    # >= 2 steps so the "parallel" grid axis can shard across v7x's 2 TensorCores.
    steps = max(2, pl.cdiv(num_rows, MAX_ROW_TILE))
    row_tile = min(MAX_ROW_TILE, ((pl.cdiv(num_rows, steps) + 15) // 16) * 16)
    return row_tile, pl.cdiv(num_rows, row_tile)


def custom_model_forward(x, weight, bias):
    """Pallas forward of CustomModel (nn.Linear(2, 1)).

    x: (B, 2), weight: (1, 2), bias: (1,)  ->  (B, 1) in x.dtype.
    """
    B, in_features = x.shape
    assert in_features == 2 and weight.shape == (1, 2) and bias.shape == (1,)
    out_dtype = x.dtype

    # ---- layout plumbing (free except the rare ragged-B zero-pad) ------------
    num_rows = pl.cdiv(B, LANE)
    if num_rows <= 16:
        # Keep tiny single-block problems sublane-aligned (multiple of 8 rows).
        num_rows = ((num_rows + 7) // 8) * 8
    b_pad = num_rows * LANE
    if b_pad != B:
        # TODO(synk): ragged batches pay one zero-pad pass here; a masked tail
        # block (pl.BoundedSlice) would avoid it if ragged B is the common case.
        x = jnp.pad(x, ((0, b_pad - B), (0, 0)))
    x2d = x.reshape(num_rows, 2 * LANE)  # free, contiguous relayout; no x.T pass

    # Expanded de-interleave weight E (256, 128): E[2j, j]=w0, E[2j+1, j]=w1.
    w0 = weight[0, 0].astype(jnp.float32)
    w1 = weight[0, 1].astype(jnp.float32)
    row = jax.lax.broadcasted_iota(jnp.int32, (2 * LANE, LANE), 0)
    col = jax.lax.broadcasted_iota(jnp.int32, (2 * LANE, LANE), 1)
    w_expand = (jnp.where(row == 2 * col, w0, 0.0)
                + jnp.where(row == 2 * col + 1, w1, 0.0)).astype(jnp.float32)

    b2d = bias.reshape(1, 1).astype(jnp.float32)

    row_tile, steps = _choose_row_tiling(num_rows)

    y2d = pl.pallas_call(
        _linear_kernel,
        out_shape=jax.ShapeDtypeStruct((num_rows, LANE), out_dtype),
        grid_spec=pltpu.PrefetchScalarGridSpec(
            num_scalar_prefetch=0,
            grid=(steps,),
            in_specs=[
                # Tiny bias lives in SMEM, read as a scalar.
                pl.BlockSpec(memory_space=pltpu.MemorySpace.SMEM),     # bias
                # Dense (row_tile, 256) activation tile, gridded over rows.
                pl.BlockSpec((row_tile, 2 * LANE), lambda i: (i, 0)),  # x
                # 128 KiB expanded weight, same block every step (stays resident).
                pl.BlockSpec((2 * LANE, LANE), lambda i: (0, 0)),      # E
            ],
            out_specs=pl.BlockSpec((row_tile, LANE), lambda i: (i, 0)),
        ),
        compiler_params=pltpu.CompilerParams(
            dimension_semantics=("parallel",),  # shards grid steps across TCs on v7x
        ),
    )(b2d, x2d, w_expand)

    y = y2d.reshape(b_pad, 1)  # free: row-major (R, 128) flattens in batch order
    return y if b_pad == B else y[:B]


if __name__ == "__main__":
    key = jax.random.PRNGKey(0)
    kw, kb, kx = jax.random.split(key, 3)

    IN_F, OUT_F = 2, 1
    # Mimic PyTorch's default U(-1/sqrt(in), 1/sqrt(in)) init deterministically.
    bound = 1.0 / (IN_F ** 0.5)
    weight = jax.random.uniform(kw, (OUT_F, IN_F), jnp.float32, -bound, bound)
    bias = jax.random.uniform(kb, (OUT_F,), jnp.float32, -bound, bound)

    fwd = jax.jit(custom_model_forward)

    # Batches exercising every tiling path:
    #   8    -> tiny batch, zero-padded to one aligned block
    #   256  -> multiple of 128, single block
    #   1000 -> ragged batch (zero-pad path)
    #   5120 -> 40 rows, 2 grid steps with a partial boundary block
    for i, batch in enumerate((8, 256, 1000, 5120)):
        xb = jax.random.normal(jax.random.fold_in(kx, i), (batch, IN_F), jnp.float32)
        y = jax.block_until_ready(fwd(xb, weight, bias))
        # Exact elementwise reference of nn.Linear(2, 1): y = x @ W^T + b.
        y_ref = xb[:, 0:1] * weight[0, 0] + xb[:, 1:2] * weight[0, 1] + bias[0]
        assert y.shape == (batch, OUT_F)
        assert jnp.allclose(y, y_ref, atol=1e-4, rtol=1e-4), f"mismatch at B={batch}"

    print("KERNEL_OK")
</pallas_src>

<mosaic_0001>
module attributes {stable_mosaic.version = 11 : i64} {
  func.func @_linear_kernel(%arg0: i32, %arg1: memref<1x1xf32, #tpu.memory_space<smem>>, %arg2: memref<8x256xf32, #tpu.memory_space<vmem>>, %arg3: memref<256x128xf32, #tpu.memory_space<vmem>>, %arg4: memref<8x128xf32, #tpu.memory_space<vmem>>) attributes {dimension_semantics = [#tpu.dimension_semantics<parallel>], iteration_bounds = array<i64: 1>, scalar_prefetch = 0 : i64, scratch_operands = 0 : i64, tpu.core_type = #tpu.core_type<tc>, window_params = [{transform_indices = @transform_0, window_bounds = array<i64: 1, 1>}, {transform_indices = @transform_1, window_bounds = array<i64: 8, 256>}, {pipeline_mode = #tpu.pipeline_mode<synchronous>, transform_indices = @transform_2, window_bounds = array<i64: 256, 128>}, {transform_indices = @transform_3, window_bounds = array<i64: 8, 128>}]} {
    %c0 = arith.constant 0 : index
    %c0_0 = arith.constant 0 : index
    %0 = vector.load %arg2[%c0, %c0_0] : memref<8x256xf32, #tpu.memory_space<vmem>>, vector<8x256xf32>
    %c0_1 = arith.constant 0 : index
    %c0_2 = arith.constant 0 : index
    %1 = vector.load %arg3[%c0_1, %c0_2] : memref<256x128xf32, #tpu.memory_space<vmem>>, vector<256x128xf32>
    %cst = arith.constant dense<0.000000e+00> : vector<8x128xf32>
    %2 = tpu.matmul %0, %1, %cst {dimension_numbers = #tpu.dot_dimension_numbers<[1], [0], [0], [1], [0, 0, 1, 1], [], []>, precision = #tpu.contract_precision<fp32>} : vector<8x256xf32>, vector<256x128xf32>, vector<8x128xf32> -> vector<8x128xf32>
    %c0_3 = arith.constant 0 : index
    %c0_4 = arith.constant 0 : index
    %3 = memref.load %arg1[%c0_3, %c0_4] : memref<1x1xf32, #tpu.memory_space<smem>>
    %4 = vector.broadcast %3 : f32 to vector<8x128xf32>
    %5 = arith.addf %2, %4 : vector<8x128xf32>
    %c0_5 = arith.constant 0 : index
    %c0_6 = arith.constant 0 : index
    %6 = vector.load %arg4[%c0_5, %c0_6] : memref<8x128xf32, #tpu.memory_space<vmem>>, vector<8x128xf32>
    tpu.vector_store %arg4[%c0_5, %c0_6], %5 {strides = array<i32>} : memref<8x128xf32, #tpu.memory_space<vmem>>, vector<8x128xf32>,
    return
  }
  func.func @transform_0(%arg0: i32) -> (i32, i32) {
    %c0_i32 = arith.constant 0 : i32
    %c0_i32_0 = arith.constant 0 : i32
    %c0_i32_1 = arith.constant 0 : i32
    return %c0_i32, %c0_i32_0 : i32, i32
  }
  func.func @transform_1(%arg0: i32) -> (i32, i32) {
    %c0_i32 = arith.constant 0 : i32
    %c0_i32_0 = arith.constant 0 : i32
    return %arg0, %c0_i32 : i32, i32
  }
  func.func @transform_2(%arg0: i32) -> (i32, i32) {
    %c0_i32 = arith.constant 0 : i32
    %c0_i32_0 = arith.constant 0 : i32
    %c0_i32_1 = arith.constant 0 : i32
    return %c0_i32, %c0_i32_0 : i32, i32
  }
  func.func @transform_3(%arg0: i32) -> (i32, i32) {
    %c0_i32 = arith.constant 0 : i32
    %c0_i32_0 = arith.constant 0 : i32
    return %arg0, %c0_i32 : i32, i32
  }
}

</mosaic_0001>

<bundles_post_ra>
// kernel: custom_model_forward.1
= control target key start
LH: loop header
LB: loop body
LE: loop exit
PB: predicated region body
PF: predicated region fallthrough
CT: control target
= control target key end

     0   :  { %s1846_s2 = inlined_call_operand.vmem [shape: f32[256,128], index: 2, kind: input, shape index: {}]   ;;  %s1847_s1 = inlined_call_operand.vmem [shape: f32[8,256], index: 1, kind: input, shape index: {}]   ;;  %s1848_s0 = inlined_call_operand.<no memory space> [shape: f32[1,1], index: 0, kind: input, shape index: {}]   ;;  %s1849_s3 = inlined_call_operand.vmem [shape: f32[8,128], index: 3, kind: output, shape index: {}]  }
   0x1   :  { %v33_v0 = vld [vmem:[%s1846_s2 + $0x80] sm:$0xff]  ;;  %v34_v1 = vld [vmem:[%s1846_s2 + $0x88] sm:$0xff]  ;;  %v35_v7 = vld [vmem:[%s1846_s2 + $0x90] sm:$0xff] }
   0x2   :  { %v17_v2 = vld [vmem:[%s1846_s2] sm:$0xff]  ;;  %v100_v3 = vand.u32 4294901760, %v33_v0  ;;  %v103_v4 = vand.u32 4294901760, %v34_v1  ;;  %v18_v5 = vld [vmem:[%s1846_s2 + $0x8] sm:$0xff]  ;;  %v36_v8 = vld [vmem:[%s1846_s2 + $0x98] sm:$0xff]  ;;  %v106_v10 = vand.u32 4294901760, %v35_v7 }
   0x3   :  { %v52_v6 = vand.u32 4294901760, %v17_v2  ;;  %v55_v9 = vand.u32 4294901760, %v18_v5  ;;  %v109_v11 = vand.u32 4294901760, %v36_v8  ;;  %v19_v12 = vld [vmem:[%s1846_s2 + $0x10] sm:$0xff]  ;;  %v20_v13 = vld [vmem:[%s1846_s2 + $0x18] sm:$0xff]  ;;  %v37_v18 = vld [vmem:[%s1846_s2 + $0xa0] sm:$0xff] }
   0x4   :  { %v1364_v14 = vpack.c.bf16 %v103_v4, %v100_v3  ;;  %v58_v16 = vand.u32 4294901760, %v19_v12  ;;  %v61_v17 = vand.u32 4294901760, %v20_v13  ;;  %v38_v19 = vld [vmem:[%s1846_s2 + $0xa8] sm:$0xff]  ;;  %v21_v23 = vld [vmem:[%s1846_s2 + $0x20] sm:$0xff]  ;;  %v1387_v25 = vsub.f32 %v35_v7, %v106_v10  ;;  %v39_v37 = vld [vmem:[%s1846_s2 + $0xb0] sm:$0xff] }
   0x5   :  { %v1366_v15 = vsub.f32 %v17_v2, %v52_v6  ;;  %v1374_v20 = vpack.c.bf16 %v55_v9, %v52_v6  ;;  %v1376_v21 = vsub.f32 %v18_v5, %v55_v9  ;;  %v1378_v22 = vpack.c.bf16 %v109_v11, %v106_v10  ;;  %v22_v24 = vld [vmem:[%s1846_s2 + $0x28] sm:$0xff]  ;;  %v40_v42 = vld [vmem:[%s1846_s2 + $0xb8] sm:$0xff]  ;;  %v23_v55 = vld [vmem:[%s1846_s2 + $0x30] sm:$0xff] }
   0x6   :  { %1129 = vmatprep.subr.bf16.mxu0 %v1364_v14  ;;  %v1389_v26 = vsub.f32 %v36_v8, %v109_v11  ;;  %v1391_v27 = vpack.c.bf16 %v61_v17, %v58_v16  ;;  %v1393_v28 = vsub.f32 %v19_v12, %v58_v16  ;;  %v112_v29 = vand.u32 4294901760, %v37_v18  ;;  %v24_v56 = vld [vmem:[%s1846_s2 + $0x38] sm:$0xff]  ;;  %v41_v5 = vld [vmem:[%s1846_s2 + $0xc0] sm:$0xff]  ;;  %v42_v6 = vld [vmem:[%s1846_s2 + $0xc8] sm:$0xff] }
   0x7   :  { %1131 = vmatpush3.bf16.msra.mxu0 %v1374_v20  ;;  %v115_v30 = vand.u32 4294901760, %v38_v19  ;;  %v1396_v31 = vsub.f32 %v33_v0, %v100_v3  ;;  %v1398_v32 = vsub.f32 %v34_v1, %v103_v4  ;;  %v64_v33 = vand.u32 4294901760, %v21_v23  ;;  %v25_v11 = vld [vmem:[%s1846_s2 + $0x40] sm:$0xff] }
   0x8   :  { %1133 = vmatprep.subr.bf16.mxu0 %v1378_v22  ;;  %v67_v34 = vand.u32 4294901760, %v22_v24  ;;  %v1866_v35 = vand.u32 4294901760, %v1366_v15  ;;  %v1865_v36 = vand.u32 4294901760, %v1376_v21  ;;  %v1406_v38 = vsub.f32 %v20_v13, %v61_v17 }
   0x9   :  { %v1408_v39 = vpack.c.bf16 %v115_v30, %v112_v29  ;;  %v1410_v40 = vsub.f32 %v37_v18, %v112_v29  ;;  %v1871_v41 = vand.u32 4294901760, %v1396_v31  ;;  %v1416_v43 = vsub.f32 %v38_v19, %v115_v30  ;;  %v26_v29 = vld [vmem:[%s1846_s2 + $0x48] sm:$0xff] }
   0xa   :  { %v1868_v44 = vand.u32 4294901760, %v1398_v32  ;;  %v1419_v45 = vpack.c.bf16 %v67_v34, %v64_v33  ;;  %v1421_v46 = vsub.f32 %v21_v23, %v64_v33  ;;  %v167_v48 = vsub.f32 %v1366_v15, %v1866_v35 }
   0xb   :  { %1135 = vmatpush3.bf16.msra.mxu0 %v1391_v27  ;;  %v279_v47 = vsub.f32 %v1396_v31, %v1871_v41  ;;  %v174_v49 = vsub.f32 %v1376_v21, %v1865_v36  ;;  %v118_v50 = vand.u32 4294901760, %v39_v37  ;;  %v121_v52 = vand.u32 4294901760, %v40_v42 }
   0xc   :  { %1137 = vmatprep.subr.bf16.mxu0 %v1408_v39  ;;  %v286_v51 = vsub.f32 %v1398_v32, %v1868_v44  ;;  %v1863_v53 = vand.u32 4294901760, %v1387_v25  ;;  %v1862_v54 = vand.u32 4294901760, %v1389_v26  ;;  %v1445_v58 = vsub.f32 %v22_v24, %v67_v34 }
   0xd   :  { %v280_v57 = vand.u32 4294901760, %v279_v47  ;;  %v168_v59 = vand.u32 4294901760, %v167_v48  ;;  %v175_v60 = vand.u32 4294901760, %v174_v49  ;;  %v1447_v62 = vpack.c.bf16 %v121_v52, %v118_v50 }
   0xe   :  { %v287_v61 = vand.u32 4294901760, %v286_v51  ;;  %v1449_v63 = vsub.f32 %v39_v37, %v118_v50  ;;  %v293_v0 = vsub.f32 %v1387_v25, %v1863_v53  ;;  %v300_v2 = vsub.f32 %v1389_v26, %v1862_v54 }
   0xf   :  { %1139 = vmatpush3.bf16.msra.mxu0 %v1419_v45  ;;  %v1162_v1 = vpack.c.bf16 %v175_v60, %v168_v59  ;;  %v70_v3 = vand.u32 4294901760, %v23_v55  ;;  %v73_v4 = vand.u32 4294901760, %v24_v56  ;;  %v1861_v9 = vand.u32 4294901760, %v1393_v28 }
  0x10   :  { %v1160_v7 = vpack.c.bf16 %v287_v61, %v280_v57  ;;  %1141 = vmatprep.subr.bf16.mxu0 %v1447_v62  ;;  %v294_v8 = vand.u32 4294901760, %v293_v0  ;;  %v1858_v10 = vand.u32 4294901760, %v1406_v38  ;;  %v1470_v12 = vsub.f32 %v40_v42, %v121_v52  ;;  %v44_v57 = vld [vmem:[%s1846_s2 + $0xd8] sm:$0xff] }
  0x11   :  { %v301_v13 = vand.u32 4294901760, %v300_v2  ;;  %v1472_v16 = vpack.c.bf16 %v73_v4, %v70_v3  ;;  %v1474_v17 = vsub.f32 %v23_v55, %v70_v3  ;;  %v181_v18 = vsub.f32 %v1393_v28, %v1861_v9 }
  0x12   :  { %1161 = vmatprep.subr.bf16.mxu1 %v1160_v7  ;;  %v188_v19 = vsub.f32 %v1406_v38, %v1858_v10  ;;  %v124_v23 = vand.u32 4294901760, %v41_v5  ;;  %v127_v24 = vand.u32 4294901760, %v42_v6  ;;  %v1856_v33 = vand.u32 4294901760, %v1410_v40 }
  0x13   :  { %1163 = vmatpush3.bf16.msra.mxu1 %v1162_v1  ;;  %v1164_v30 = vpack.c.bf16 %v301_v13, %v294_v8  ;;  %1143 = vmatpush3.bf16.msra.mxu0 %v1472_v16  ;;  %v1855_v34 = vand.u32 4294901760, %v1416_v43  ;;  %v76_v37 = vand.u32 4294901760, %v25_v11  ;;  %v1488_v42 = vsub.f32 %v24_v56, %v73_v4  ;;  %v43_v56 = vld [vmem:[%s1846_s2 + $0xd0] sm:$0xff] }
  0x14   :  { %v182_v47 = vand.u32 4294901760, %v181_v18  ;;  %v189_v48 = vand.u32 4294901760, %v188_v19  ;;  %v1490_v49 = vpack.c.bf16 %v127_v24, %v124_v23  ;;  %v1492_v50 = vsub.f32 %v41_v5, %v124_v23  ;;  %v27_v1 = vld [vmem:[%s1846_s2 + $0x50] sm:$0xff]  ;;  %v28_v18 = vld [vmem:[%s1846_s2 + $0x58] sm:$0xff] }
  0x15   :  { %1165 = vmatprep.subr.bf16.mxu1 %v1164_v30  ;;  %v307_v51 = vsub.f32 %v1410_v40, %v1856_v33  ;;  %v314_v52 = vsub.f32 %v1416_v43, %v1855_v34  ;;  %v79_v55 = vand.u32 4294901760, %v26_v29  ;;  %v1507_v60 = vsub.f32 %v42_v6, %v127_v24 }
  0x16   :  { %v1166_v59 = vpack.c.bf16 %v189_v48, %v182_v47  ;;  %1145 = vmatprep.subr.bf16.mxu0 %v1490_v49  ;;  %v1853_v61 = vand.u32 4294901760, %v1421_v46  ;;  %v1852_v0 = vand.u32 4294901760, %v1445_v58  ;;  %v1516_v5 = vsub.f32 %v25_v11, %v76_v37 }
  0x17   :  { %v308_v2 = vand.u32 4294901760, %v307_v51  ;;  %v315_v3 = vand.u32 4294901760, %v314_v52  ;;  %v1514_v4 = vpack.c.bf16 %v79_v55, %v76_v37  ;;  %v130_v8 = vand.u32 4294901760, %v43_v56 }
  0x18   :  { %1167 = vmatpush3.bf16.msra.mxu1 %v1166_v59  ;;  %v195_v6 = vsub.f32 %v1421_v46, %v1853_v61  ;;  %v202_v7 = vsub.f32 %v1445_v58, %v1852_v0  ;;  %v133_v13 = vand.u32 4294901760, %v44_v57  ;;  %v1851_v11 = vand.u32 4294901760, %v1449_v63 }
  0x19   :  { %v1168_v19 = vpack.c.bf16 %v315_v3, %v308_v2  ;;  %1147 = vmatpush3.bf16.msra.mxu0 %v1514_v4  ;;  %v1850_v23 = vand.u32 4294901760, %v1470_v12  ;;  %v82_v24 = vand.u32 4294901760, %v27_v1  ;;  %v1530_v30 = vsub.f32 %v26_v29, %v79_v55  ;;  %v45_v29 = vld [vmem:[%s1846_s2 + $0xe0] sm:$0xff]  ;;  %v46_v55 = vld [vmem:[%s1846_s2 + $0xe8] sm:$0xff] }
  0x1a   :  { %v196_v37 = vand.u32 4294901760, %v195_v6  ;;  %v203_v47 = vand.u32 4294901760, %v202_v7  ;;  %v1532_v48 = vpack.c.bf16 %v133_v13, %v130_v8  ;;  %v1534_v51 = vsub.f32 %v43_v56, %v130_v8  ;;  %v29_v8 = vld [vmem:[%s1846_s2 + $0x60] sm:$0xff] }
  0x1b   :  { %1169 = vmatprep.subr.bf16.mxu1 %v1168_v19  ;;  %v321_v52 = vsub.f32 %v1449_v63, %v1851_v11  ;;  %v328_v59 = vsub.f32 %v1470_v12, %v1850_v23  ;;  %v85_v2 = vand.u32 4294901760, %v28_v18  ;;  %v1549_v56 = vsub.f32 %v44_v57, %v133_v13 }
  0x1c   :  { %v1170_v3 = vpack.c.bf16 %v203_v47, %v196_v37  ;;  %1149 = vmatprep.subr.bf16.mxu0 %v1532_v48  ;;  %v1854_v6 = vand.u32 4294901760, %v1474_v17  ;;  %v1857_v7 = vand.u32 4294901760, %v1488_v42  ;;  %v1558_v0 = vsub.f32 %v27_v1, %v82_v24 }
  0x1d   :  { %v322_v19 = vand.u32 4294901760, %v321_v52  ;;  %v329_v23 = vand.u32 4294901760, %v328_v59  ;;  %v1556_v11 = vpack.c.bf16 %v85_v2, %v82_v24  ;;  %v136_v37 = vand.u32 4294901760, %v45_v29  ;;  %v30_v52 = vld [vmem:[%s1846_s2 + $0x68] sm:$0xff] }
  0x1e   :  { %1171 = vmatpush3.bf16.msra.mxu1 %v1170_v3  ;;  %v209_v57 = vsub.f32 %v1474_v17, %v1854_v6  ;;  %v216_v13 = vsub.f32 %v1488_v42, %v1857_v7  ;;  %v139_v47 = vand.u32 4294901760, %v46_v55  ;;  %v1860_v1 = vand.u32 4294901760, %v1492_v50 }
  0x1f   :  { %v1172_v59 = vpack.c.bf16 %v329_v23, %v322_v19  ;;  %1151 = vmatpush3.bf16.msra.mxu0 %v1556_v11  ;;  %v1859_v24 = vand.u32 4294901760, %v1507_v60  ;;  %v88_v3 = vand.u32 4294901760, %v29_v8  ;;  %v1572_v61 = vsub.f32 %v28_v18, %v85_v2  ;;  %v47_v18 = vld [vmem:[%s1846_s2 + $0xf0] sm:$0xff]  ;;  %v48_v2 = vld [vmem:[%s1846_s2 + $0xf8] sm:$0xff] }
  0x20   :  { %v210_v6 = vand.u32 4294901760, %v209_v57  ;;  %v217_v34 = vand.u32 4294901760, %v216_v13  ;;  %v1574_v33 = vpack.c.bf16 %v139_v47, %v136_v37  ;;  %v1576_v7 = vsub.f32 %v45_v29, %v136_v37 }
  0x21   :  { %1173 = vmatprep.subr.bf16.mxu1 %v1172_v59  ;;  %v335_v23 = vsub.f32 %v1492_v50, %v1860_v1  ;;  %v342_v19 = vsub.f32 %v1507_v60, %v1859_v24  ;;  %v91_v10 = vand.u32 4294901760, %v30_v52  ;;  %v1591_v29 = vsub.f32 %v46_v55, %v139_v47  ;;  %v31_v59 = vld [vmem:[%s1846_s2 + $0x70] sm:$0xff] }
  0x22   :  { %v1174_v57 = vpack.c.bf16 %v217_v34, %v210_v6  ;;  %1153 = vmatprep.subr.bf16.mxu0 %v1574_v33  ;;  %v1864_v13 = vand.u32 4294901760, %v1516_v5  ;;  %v1867_v37 = vand.u32 4294901760, %v1530_v30  ;;  %v1600_v54 = vsub.f32 %v29_v8, %v88_v3 }
  0x23   :  { %v336_v24 = vand.u32 4294901760, %v335_v23  ;;  %v343_v1 = vand.u32 4294901760, %v342_v19  ;;  %v1598_v9 = vpack.c.bf16 %v91_v10, %v88_v3  ;;  %v142_v6 = vand.u32 4294901760, %v47_v18  ;;  %v32_v23 = vld [vmem:[%s1846_s2 + $0x78] sm:$0xff] }
  0x24   :  { %1175 = vmatpush3.bf16.msra.mxu1 %v1174_v57  ;;  %v223_v34 = vsub.f32 %v1516_v5, %v1864_v13  ;;  %v230_v55 = vsub.f32 %v1530_v30, %v1867_v37  ;;  %v145_v47 = vand.u32 4294901760, %v48_v2  ;;  %v1870_v8 = vand.u32 4294901760, %v1534_v51 }
  0x25   :  { %1894 = vst [vmem:[#allocation3_spill] sm:$0xff] %v1598_v9  ;;  %v1176_v19 = vpack.c.bf16 %v343_v1, %v336_v24  ;;  %1155 = vmatpush3.bf16.msra.mxu0 %v1598_v9  ;;  %v1869_v3 = vand.u32 4294901760, %v1549_v56  ;;  %v94_v57 = vand.u32 4294901760, %v31_v59  ;;  %v1614_v53 = vsub.f32 %v30_v52, %v91_v10  ;;  %v15_v10 = vld [vmem:[%s1847_s1] sm:$0xff]  ;;  %v16_v52 = vld [vmem:[%s1847_s1 + $0x8] sm:$0xff] }
  0x26   :  { %v224_v13 = vand.u32 4294901760, %v223_v34  ;;  %v231_v36 = vand.u32 4294901760, %v230_v55  ;;  %v1616_v35 = vpack.c.bf16 %v145_v47, %v142_v6  ;;  %v1618_v37 = vsub.f32 %v47_v18, %v142_v6 }
  0x27   :  { %1177 = vmatprep.subr.bf16.mxu1 %v1176_v19  ;;  %v349_v1 = vsub.f32 %v1534_v51, %v1870_v8  ;;  %v356_v24 = vsub.f32 %v1549_v56, %v1869_v3  ;;  %v97_v44 = vand.u32 4294901760, %v32_v23  ;;  %v1633_v18 = vsub.f32 %v48_v2, %v145_v47 }
  0x28   :  { %1895 = vst [vmem:[#allocation4_spill] sm:$0xff] %v1616_v35  ;;  %v1178_v34 = vpack.c.bf16 %v231_v36, %v224_v13  ;;  %1157 = vmatprep.subr.bf16.mxu0 %v1616_v35  ;;  %v1874_v55 = vand.u32 4294901760, %v1558_v0  ;;  %v1875_v6 = vand.u32 4294901760, %v1572_v61  ;;  %v1639_v41 = vsub.f32 %v31_v59, %v94_v57 }
  0x29   :  { %v350_v19 = vand.u32 4294901760, %v349_v1  ;;  %v357_v3 = vand.u32 4294901760, %v356_v24  ;;  %v1637_v8 = vpack.c.bf16 %v97_v44, %v94_v57  ;;  %v1647_v2 = vand.u32 4294901760, %v16_v52 }
  0x2a   :  { %1179 = vmatpush3.bf16.msra.mxu1 %v1178_v34  ;;  %v237_v9 = vsub.f32 %v1558_v0, %v1874_v55  ;;  %v244_v36 = vsub.f32 %v1572_v61, %v1875_v6  ;;  %v1649_v13 = vand.u32 4294901760, %v15_v10  ;;  %v1882_v1 = vand.u32 4294901760, %v1576_v7 }
  0x2b   :  { %1896 = vst [vmem:[#allocation5_spill] sm:$0xff] %v1637_v8  ;;  %1897 = vst [vmem:[#allocation6_spill] sm:$0xff] %v1647_v2  ;;  %v1180_v47 = vpack.c.bf16 %v357_v3, %v350_v19  ;;  %1159 = vmatpush3.bf16.msra.mxu0 %v1637_v8  ;;  %v1884_v59 = vand.u32 4294901760, %v1591_v29  ;;  %v1192_v57 = vpack.c.bf16 %v1398_v32, %v1396_v31  ;;  %388 = vmatprep.mubr.f32.mxu1 %v1647_v2 }
  0x2c   :  { %v238_v24 = vand.u32 4294901760, %v237_v9  ;;  %v245_v34 = vand.u32 4294901760, %v244_v36  ;;  %v1657_v55 = vsub.f32 %v16_v52, %v1647_v2  ;;  %v1660_v6 = vsub.f32 %v15_v10, %v1649_v13 }
  0x2d   :  { %1181 = vmatprep.subr.bf16.mxu1 %v1180_v47  ;;  %v363_v3 = vsub.f32 %v1576_v7, %v1882_v1  ;;  %v370_v19 = vsub.f32 %v1591_v29, %v1884_v59  ;;  %1193 = vmatprep.subr.bf16.mxu0 %v1192_v57  ;;  %v1883_v9 = vand.u32 4294901760, %v1600_v54  ;;  %v1885_v52 = vand.u32 4294901760, %v1614_v53 }
  0x2e   :  { %1898 = vst [vmem:[#allocation7_spill] sm:$0xff] %v1660_v6  ;;  %v1671_v36 = vsub.f32 %v32_v23, %v97_v44  ;;  %v1182_v10 = vpack.c.bf16 %v245_v34, %v238_v24  ;;  %v1886_v8 = vand.u32 4294901760, %v1657_v55  ;;  %v1887_v47 = vand.u32 4294901760, %v1660_v6 }
  0x2f   :  { %v364_v35 = vand.u32 4294901760, %v363_v3  ;;  %v371_v2 = vand.u32 4294901760, %v370_v19  ;;  %v251_v1 = vsub.f32 %v1600_v54, %v1883_v9  ;;  %v258_v57 = vsub.f32 %v1614_v53, %v1885_v52 }
  0x30   :  { %1183 = vmatpush3.bf16.msra.mxu1 %v1182_v10  ;;  %v150_v44 = vsub.f32 %v1657_v55, %v1886_v8  ;;  %v156_v23 = vsub.f32 %v1660_v6, %v1887_v47  ;;  %v1893_v24 = vand.u32 4294901760, %v1618_v37  ;;  %v1890_v34 = vand.u32 4294901760, %v1633_v18 }
  0x31   :  { %v1184_v3 = vpack.c.bf16 %v371_v2, %v364_v35  ;;  %v252_v19 = vand.u32 4294901760, %v251_v1  ;;  %v259_v9 = vand.u32 4294901760, %v258_v57  ;;  %v1194_v59 = vpack.c.bf16 %v1376_v21, %v1366_v15 }
  0x32   :  { %v151_v52 = vand.u32 4294901760, %v150_v44  ;;  %v157_v10 = vand.u32 4294901760, %v156_v23  ;;  %v377_v8 = vsub.f32 %v1618_v37, %v1893_v24  ;;  %v384_v47 = vsub.f32 %v1633_v18, %v1890_v34 }
  0x33   :  { %1185 = vmatprep.subr.bf16.mxu1 %v1184_v3  ;;  %v1186_v6 = vpack.c.bf16 %v259_v9, %v252_v19  ;;  %v1196_v35 = vpack.c.bf16 %v1389_v26, %v1387_v25  ;;  %v1892_v2 = vand.u32 4294901760, %v1639_v41  ;;  %v1891_v1 = vand.u32 4294901760, %v1671_v36 }
  0x34   :  { %152 = vmatprep.mubr.f32.mxu0 %v151_v52  ;;  %v378_v57 = vand.u32 4294901760, %v377_v8  ;;  %v385_v44 = vand.u32 4294901760, %v384_v47  ;;  %v1198_v19 = vpack.c.bf16 %v1406_v38, %v1393_v28  ;;  %v1200_v8 = vpack.c.bf16 %v1416_v43, %v1410_v40 }
  0x35   :  { %158 = vmatmul.mubr.f32.vlgmr.msra.gmra.mrb[0].mxu0 %v157_v10  ;;  %1187 = vmatpush3.bf16.msra.mxu1 %v1186_v6  ;;  %v265_v23 = vsub.f32 %v1639_v41, %v1892_v2  ;;  %v272_v9 = vsub.f32 %v1671_v36, %v1891_v1  ;;  %v1202_v6 = vpack.c.bf16 %v1445_v58, %v1421_v46  ;;  %v1899_v10 = vand.u32 4294901760, %v1396_v31 }
  0x36   :  { %1195 = vmatpush3.bf16.msra.mxu0 %v1194_v59  ;;  %v1188_v3 = vpack.c.bf16 %v385_v44, %v378_v57  ;;  %525 = vmatprep.mubr.f32.mxu0 %v1657_v55  ;;  %v1204_v47 = vpack.c.bf16 %v1470_v12, %v1449_v63  ;;  %v1900_v57 = vand.u32 4294901760, %v1398_v32  ;;  %v1901_v44 = vand.u32 4294901760, %v1366_v15 }
  0x37   :  { %1197 = vmatprep.subr.bf16.mxu0 %v1196_v35  ;;  %v266_v34 = vand.u32 4294901760, %v265_v23  ;;  %v273_v52 = vand.u32 4294901760, %v272_v9  ;;  %v1902_v23 = vand.u32 4294901760, %v1376_v21  ;;  %v1903_v1 = vand.u32 4294901760, %v1387_v25 }
  0x38   :  { %1189 = vmatprep.subr.bf16.mxu1 %v1188_v3  ;;  %v1256_v35 = vpack.c.bf16 %v1900_v57, %v1899_v10  ;;  %v1904_v3 = vand.u32 4294901760, %v1389_v26  ;;  %v1905_v24 = vand.u32 4294901760, %v1393_v28  ;;  %v1907_v31 = vand.u32 4294901760, %v1410_v40 }
  0x39   :  { %v1190_v59 = vpack.c.bf16 %v273_v52, %v266_v34  ;;  %v1258_v9 = vpack.c.bf16 %v1902_v23, %v1901_v44  ;;  %v1906_v34 = vand.u32 4294901760, %v1406_v38  ;;  %v1908_v32 = vand.u32 4294901760, %v1416_v43  ;;  %v1923_v23 = vld [vmem:[#allocation4_spill] sm:$0xff] }
  0x3a   :  { %v1260_v2 = vpack.c.bf16 %v1904_v3, %v1903_v1  ;;  %1199 = vmatpush3.bf16.msra.mxu0 %v1198_v19  ;;  %v1909_v15 = vand.u32 4294901760, %v1421_v46  ;;  %v1910_v21 = vand.u32 4294901760, %v1445_v58  ;;  %v1911_v25 = vand.u32 4294901760, %v1449_v63  ;;  %v1924_v3 = vld [vmem:[#allocation5_spill] sm:$0xff] }
  0x3b   :  { %v1262_v52 = vpack.c.bf16 %v1906_v34, %v1905_v24  ;;  %v1264_v10 = vpack.c.bf16 %v1908_v32, %v1907_v31  ;;  %v1912_v26 = vand.u32 4294901760, %v1470_v12  ;;  %1191 = vmatpush3.bf16.msra.mxu1 %v1190_v59  ;;  %1201 = vmatprep.subr.bf16.mxu0 %v1200_v8  ;;  %v1913_v28 = vand.u32 4294901760, %v1474_v17 }
  0x3c   :  { %v1266_v57 = vpack.c.bf16 %v1910_v21, %v1909_v15  ;;  %v1914_v38 = vand.u32 4294901760, %v1488_v42  ;;  %v1915_v43 = vand.u32 4294901760, %v1492_v50  ;;  %v1916_v24 = vand.u32 4294901760, %v1507_v60  ;;  %1225 = vmatprep.subr.bf16.mxu1 %v1364_v14 }
  0x3d   :  { %v1268_v1 = vpack.c.bf16 %v1912_v26, %v1911_v25  ;;  %v1917_v58 = vand.u32 4294901760, %v1516_v5  ;;  %v1918_v19 = vand.u32 4294901760, %v1530_v30  ;;  %v1206_v12 = vpack.c.bf16 %v1488_v42, %v1474_v17 }
  0x3e   :  { %v1270_v40 = vpack.c.bf16 %v1914_v38, %v1913_v28  ;;  %v1272_v46 = vpack.c.bf16 %v1916_v24, %v1915_v43  ;;  %390 = vmatmul.mubr.f32.vlgmr.msra.gmra.mrb[0].mxu1 %v1649_v13  ;;  %1203 = vmatpush3.bf16.msra.mxu0 %v1202_v6  ;;  %v1208_v8 = vpack.c.bf16 %v1507_v60, %v1492_v50  ;;  %v1919_v59 = vand.u32 4294901760, %v1657_v55  ;;  %v1920_v55 = vld [vmem:[#allocation7_spill] sm:$0xff]  ;;  %v1921_v6 = vld [vmem:[#allocation6_spill] sm:$0xff] }
  0x3f   :  { %v1274_v63 = vpack.c.bf16 %v1918_v19, %v1917_v58  ;;  %1227 = vmatpush3.bf16.msra.mxu1 %v1374_v20  ;;  %1205 = vmatprep.subr.bf16.mxu0 %v1204_v47  ;;  %v1210_v44 = vpack.c.bf16 %v1530_v30, %v1516_v5  ;;  %v1212_v17 = vpack.c.bf16 %v1549_v56, %v1534_v51  ;;  %v1922_v47 = vld [vmem:[#allocation3_spill] sm:$0xff]  ;;  %v1928_v34 = vand.u32 4294901760, %v1558_v0 }
  0x40   :  { %1229 = vmatprep.subr.bf16.mxu1 %v1378_v22  ;;  %632 = vmatprep.mubr.f32.mxu1 %v1919_v59  ;;  %v1214_v42 = vpack.c.bf16 %v1572_v61, %v1558_v0  ;;  %v1216_v50 = vpack.c.bf16 %v1591_v29, %v1576_v7  ;;  %v1218_v60 = vpack.c.bf16 %v1614_v53, %v1600_v54 }
  0x41   :  { %v1220_v5 = vpack.c.bf16 %v1633_v18, %v1618_v37  ;;  %v1222_v30 = vpack.c.bf16 %v1671_v36, %v1639_v41 }
  0x42   :  { %1207 = vmatpush3.bf16.msra.mxu0 %v1206_v12 }
  0x43   :  { %1231 = vmatpush3.bf16.msra.mxu1 %v1391_v27  ;;  %1209 = vmatprep.subr.bf16.mxu0 %v1208_v8 }
  0x44   :  { %1233 = vmatprep.subr.bf16.mxu1 %v1408_v39 }
  0x46   :  { %1211 = vmatpush3.bf16.msra.mxu0 %v1210_v44 }
  0x47   :  { %1235 = vmatpush3.bf16.msra.mxu1 %v1419_v45  ;;  %1213 = vmatprep.subr.bf16.mxu0 %v1212_v17 }
  0x48   :  { %1237 = vmatprep.subr.bf16.mxu1 %v1447_v62 }
  0x4a   :  { %1215 = vmatpush3.bf16.msra.mxu0 %v1214_v42 }
  0x4b   :  { %1239 = vmatpush3.bf16.msra.mxu1 %v1472_v16  ;;  %1217 = vmatprep.subr.bf16.mxu0 %v1216_v50 }
  0x4c   :  { %1241 = vmatprep.subr.bf16.mxu1 %v1490_v49 }
  0x4e   :  { %1219 = vmatpush3.bf16.msra.mxu0 %v1218_v60 }
  0x4f   :  { %1243 = vmatpush3.bf16.msra.mxu1 %v1514_v4  ;;  %1221 = vmatprep.subr.bf16.mxu0 %v1220_v5 }
  0x50   :  { %1245 = vmatprep.subr.bf16.mxu1 %v1532_v48 }
  0x52   :  { %1223 = vmatpush3.bf16.msra.mxu0 %v1222_v30 }
  0x53   :  { %1247 = vmatpush3.bf16.msra.mxu1 %v1556_v11  ;;  %1257 = vmatprep.subr.bf16.mxu0 %v1256_v35  ;;  %v1925_v35 = vand.u32 4294901760, %v1920_v55 }
  0x54   :  { %1249 = vmatprep.subr.bf16.mxu1 %v1574_v33 }
  0x55   :  { %528 = vmatmul.mubr.f32.vlgmr.msra.gmra.mrb[2].mxu0 %v1920_v55 }
  0x56   :  { %1259 = vmatpush3.bf16.msra.mxu0 %v1258_v9  ;;  %802 = vmatprep.mubr.f32.mxu0 %v1921_v6  ;;  %v1927_v9 = vand.u32 4294901760, %v1549_v56 }
  0x57   :  { %1251 = vmatpush3.bf16.msra.mxu1 %v1922_v47  ;;  %1261 = vmatprep.subr.bf16.mxu0 %v1260_v2  ;;  %v1926_v2 = vand.u32 4294901760, %v1534_v51  ;;  %v1932_v51 = vand.u32 4294901760, %v1600_v54 }
  0x58   :  { %1253 = vmatprep.subr.bf16.mxu1 %v1923_v23 }
  0x5a   :  { %1263 = vmatpush3.bf16.msra.mxu0 %v1262_v52 }
  0x5b   :  { %1255 = vmatpush3.bf16.msra.mxu1 %v1924_v3  ;;  %1265 = vmatprep.subr.bf16.mxu0 %v1264_v10 }
  0x5c   :  { %1289 = vmatprep.subr.bf16.mxu1 %v1364_v14  ;;  %v1276_v14 = vpack.c.bf16 %v1927_v9, %v1926_v2 }
  0x5e   :  { %636 = vmatmul.mubr.f32.vlgmr.msra.gmra.mrb[2].mxu1 %v1925_v35  ;;  %1267 = vmatpush3.bf16.msra.mxu0 %v1266_v57 }
  0x5f   :  { %1291 = vmatpush3.bf16.msra.mxu1 %v1374_v20  ;;  %1269 = vmatprep.subr.bf16.mxu0 %v1268_v1  ;;  %v1929_v20 = vand.u32 4294901760, %v1572_v61  ;;  %v1934_v61 = vand.u32 4294901760, %v1618_v37 }
  0x60   :  { %1293 = vmatprep.subr.bf16.mxu1 %v1378_v22  ;;  %906 = vmatprep.mubr.f32.mxu1 %v1921_v6  ;;  %v1930_v22 = vand.u32 4294901760, %v1576_v7  ;;  %v1936_v7 = vand.u32 4294901760, %v1639_v41 }
  0x61   :  { %v1278_v52 = vpack.c.bf16 %v1929_v20, %v1928_v34 }
  0x62   :  { %1271 = vmatpush3.bf16.msra.mxu0 %v1270_v40 }
  0x63   :  { %1295 = vmatpush3.bf16.msra.mxu1 %v1391_v27  ;;  %1273 = vmatprep.subr.bf16.mxu0 %v1272_v46  ;;  %v1931_v27 = vand.u32 4294901760, %v1591_v29 }
  0x64   :  { %1297 = vmatprep.subr.bf16.mxu1 %v1408_v39  ;;  %v1933_v39 = vand.u32 4294901760, %v1614_v53 }
  0x65   :  { %v1280_v31 = vpack.c.bf16 %v1931_v27, %v1930_v22 }
  0x66   :  { %1275 = vmatpush3.bf16.msra.mxu0 %v1274_v63  ;;  %v1282_v56 = vpack.c.bf16 %v1933_v39, %v1932_v51 }
  0x67   :  { %1299 = vmatpush3.bf16.msra.mxu1 %v1419_v45  ;;  %1277 = vmatprep.subr.bf16.mxu0 %v1276_v14  ;;  %v1935_v45 = vand.u32 4294901760, %v1633_v18 }
  0x68   :  { %1301 = vmatprep.subr.bf16.mxu1 %v1447_v62  ;;  %v1937_v62 = vand.u32 4294901760, %v1671_v36 }
  0x69   :  { %v1284_v0 = vpack.c.bf16 %v1935_v45, %v1934_v61 }
  0x6a   :  { %1279 = vmatpush3.bf16.msra.mxu0 %v1278_v52  ;;  %v1286_v29 = vpack.c.bf16 %v1937_v62, %v1936_v7 }
  0x6b   :  { %1303 = vmatpush3.bf16.msra.mxu1 %v1472_v16  ;;  %1281 = vmatprep.subr.bf16.mxu0 %v1280_v31  ;;  %v50_v16 = vstv %s1848_s0 }
  0x6c   :  { %1305 = vmatprep.subr.bf16.mxu1 %v1490_v49 }
  0x6e   :  { %1283 = vmatpush3.bf16.msra.mxu0 %v1282_v56 }
  0x6f   :  { %1307 = vmatpush3.bf16.msra.mxu1 %v1514_v4  ;;  %1285 = vmatprep.subr.bf16.mxu0 %v1284_v0 }
  0x70   :  { %1309 = vmatprep.subr.bf16.mxu1 %v1532_v48 }
  0x72   :  { %1287 = vmatpush3.bf16.msra.mxu0 %v1286_v29 }
  0x73   :  { %1311 = vmatpush3.bf16.msra.mxu1 %v1556_v11 }
  0x74   :  { %1313 = vmatprep.subr.bf16.mxu1 %v1574_v33 }
  0x75   :  { %804 = vmatmul.mubr.f32.vlgmr.msra.gmra.mrb[4].mxu0 %v1649_v13 }
  0x77   :  { %1315 = vmatpush3.bf16.msra.mxu1 %v1922_v47 }
  0x78   :  { %1317 = vmatprep.subr.bf16.mxu1 %v1923_v23 }
  0x7b   :  { %1319 = vmatpush3.bf16.msra.mxu1 %v1924_v3 }
  0x7e   :  { %908 = vmatmul.mubr.f32.vlgmr.msra.gmra.mrb[4].mxu1 %v1649_v13 }
 0x108   :  { %v950_v41 = vpop.f32.mrb[0].mxu0 }
 0x109   :  { %v951_v53 = vpop.f32.mrb[1].mxu0 }
 0x10a   :  { %v952_v54 = vadd.f32 %v951_v53, %v950_v41 }
 0x10c   :  { %v160_v49 = vadd.f32 %v952_v54, %v50_v16 }
 0x111   :  { %v985_v4 = vpop.f32.mrb[0].mxu1 }
 0x112   :  { %v986_v33 = vpop.f32.mrb[1].mxu1 }
 0x113   :  { %v987_v11 = vadd.f32 %v986_v33, %v985_v4 }
 0x115   :  { %v392_v48 = vadd.f32 %v987_v11, %v160_v49 }
 0x128   :  { %v1020_v37 = vpop.f32.mrb[2].mxu0 }
 0x129   :  { %v1021_v18 = vpop.f32.mrb[3].mxu0 }
 0x12a   :  { %v1022_v36 = vadd.f32 %v1021_v18, %v1020_v37 }
 0x12c   :  { %v530_v32 = vadd.f32 %v1022_v36, %v392_v48 }
 0x131   :  { %v1055_v10 = vpop.f32.mrb[2].mxu1 }
 0x132   :  { %v1056_v15 = vpop.f32.mrb[3].mxu1 }
 0x133   :  { %v1057_v21 = vadd.f32 %v1056_v15, %v1055_v10 }
 0x135   :  { %v638_v13 = vadd.f32 %v1057_v21, %v530_v32 }
 0x148   :  { %v1090_v57 = vpop.f32.mrb[4].mxu0 }
 0x149   :  { %v1091_v25 = vpop.f32.mrb[5].mxu0 }
 0x14a   :  { %v1092_v26 = vadd.f32 %v1091_v25, %v1090_v57 }
 0x14c   :  { %v806_v1 = vadd.f32 %v1092_v26, %v638_v13 }
 0x151   :  { %v1125_v28 = vpop.f32.mrb[4].mxu1 }
 0x152   :  { %v1126_v38 = vpop.f32.mrb[5].mxu1 }
 0x153   :  { %v1127_v40 = vadd.f32 %v1126_v38, %v1125_v28 }
 0x155   :  { %v910_v43 = vadd.f32 %v1127_v40, %v806_v1 }
 0x157   :  { %913 = vst [vmem:[%s1849_s3] sm:$0xff] %v910_v43 }

</bundles_post_ra>
